<compile_context>
chip_gen: v7x
topology: tpu7x:2x2x1
jax: 0.10.0
libtpu: 0.0.40
codegen_flags: <defaults>
</compile_context>

<pallas_src>
import functools

import jax
import jax.numpy as jnp
from jax.experimental import pallas as pl
from jax.experimental.pallas import tpu as pltpu


# Target for the double-buffered pipeline working set (inputs + lane-padded target tiles).
_PIPELINE_VMEM_BUDGET = 40 * 1024 * 1024


def _ce_kl_enp_kernel(tgt_ref, logits_ref, cent_ref, out_ref, *, n_total, tiles_per_core):
    ci = pl.program_id(0)   # core-split axis ("parallel")
    ji = pl.program_id(1)   # batch-tile axis ("arbitrary", accumulation)

    # The (1, 3, C) output block is resident across the ji axis -> acts as a per-core
    # vector accumulator. Zero it at the start of each core's sweep.
    @pl.when(ji == 0)
    def _():
        out_ref[...] = jnp.zeros_like(out_ref)

    x = logits_ref[...].astype(jnp.float32)     # (block_n, C) logits tile
    cent = cent_ref[...].astype(jnp.float32)    # (block_n, C) centroid probabilities
    tgt = tgt_ref[...]                          # (block_n, 1) int32 class ids

    blk_n, c = x.shape

    # Absolute (unclamped) linear tile id -> row-validity mask. This zeroes out
    #   (a) the padded rows of the last real (partial) tile,
    #   (b) the whole duplicated tile of the core-split remainder grid step.
    tile = ci * tiles_per_core + ji
    row_ids = tile * blk_n + jax.lax.broadcasted_iota(jnp.int32, (blk_n, 1), 0)
    valid = row_ids < n_total                   # (block_n, 1) bool

    # Numerically stable log-softmax / softmax over the class (lane) axis.
    m = jnp.max(x, axis=1, keepdims=True)
    shifted = x - m
    ex = jnp.exp(shifted)
    sumexp = jnp.sum(ex, axis=1, keepdims=True)
    logp = shifted - jnp.log(sumexp)            # log_softmax(output, 1)
    p = ex / sumexp                             # softmax(output, 1) -- exact divide
    plogp = p * logp                            # shared by the KL and entropy terms

    # 1) CrossEntropyLoss numerator: -logp[row, target[row]] via iota == target mask.
    col_ids = jax.lax.broadcasted_iota(jnp.int32, (blk_n, c), 1)
    ce_el = jnp.where(col_ids == tgt, -logp, 0.0)
    # 2) kl_div(centroids.log(), log_softmax(output), 'batchmean', log_target=True)
    #    element: p * (logp - log(centroids))
    kl_el = plogp - p * jnp.log(cent)
    # 3) Guarded entropy element: p*log(p) where p >= 1e-10 else 0 (sign handled outside).
    ent_el = jnp.where(p < 1e-10, 0.0, plogp)

    # Mask invalid rows with selects (NaN/garbage in padded rows cannot leak), reduce over
    # rows only (sublane reduce) and accumulate as (3, C) lane vectors -- no per-step
    # scalar-path / SMEM work.
    ce_l = jnp.sum(jnp.where(valid, ce_el, 0.0), axis=0, keepdims=True)    # (1, C)
    kl_l = jnp.sum(jnp.where(valid, kl_el, 0.0), axis=0, keepdims=True)    # (1, C)
    ent_l = jnp.sum(jnp.where(valid, ent_el, 0.0), axis=0, keepdims=True)  # (1, C)

    out_ref[...] += jnp.concatenate([ce_l, kl_l, ent_l], axis=0)[None]     # (1, 3, C)


def ce_kl_enp_loss(output, target, centroids, block_n=None):
    """output: (N, C) logits (f32 or bf16); target: (N,) int class ids;
    centroids: (N, C) strictly-positive probabilities (f32 or bf16).

    Returns a (3,) float32 array: [cross_entropy, kl_batchmean, -mean(entropy)].
    """
    n, c = output.shape
    assert centroids.shape == (n, c)
    assert target.shape == (n,)

    isz_x = output.dtype.itemsize
    isz_c = centroids.dtype.itemsize
    # Sublane multiple for the row axis: 8 for f32, 16 for bf16 (packed (16,128) tiles).
    row_mult = max(8, 32 // min(isz_x, isz_c))

    # Double-buffered pipeline bytes per block row: logits + centroids tiles plus the
    # lane-padded (block_n, 1) int32 target tile (1 column pads to 128 lanes -> 512 B/row).
    per_row = 2 * (c * (isz_x + isz_c) + 128 * 4)

    if block_n is None:
        cap = max(row_mult, (_PIPELINE_VMEM_BUDGET // per_row) // row_mult * row_mult)
        block_n = min(cap, pl.cdiv(n, row_mult) * row_mult)

    n_blocks = pl.cdiv(n, block_n)
    num_cores = 2 if n_blocks > 1 else 1      # v7x: batch tiles split across both TCs
    tpc = pl.cdiv(n_blocks, num_cores)        # tiles per core

    # Explicit VMEM limit (guard for very large C at the minimum block size), instead of
    # relying on the 16/32/32 MiB per-generation defaults. 48 MiB fits v7x's 64 MiB VMEM.
    est = block_n * per_row + 2 * (3 * c * 4) + (1 << 20)
    vmem_limit = int(min(max(est, 48 * 1024 * 1024), 100 * 1024 * 1024))

    pad_steps = (num_cores * tpc) != n_blocks

    def data_idx(ci, ji):
        t = ci * tpc + ji
        if pad_steps:
            # Remainder grid step of the core split: clamp so its DMA reads a valid block;
            # its rows are masked out in-kernel via the absolute row-id check.
            t = jnp.minimum(t, n_blocks - 1)
        return (t, 0)

    kernel = functools.partial(_ce_kl_enp_kernel, n_total=n, tiles_per_core=tpc)

    partials = pl.pallas_call(
        kernel,
        out_shape=jax.ShapeDtypeStruct((num_cores, 3, c), jnp.float32),
        grid_spec=pltpu.PrefetchScalarGridSpec(
            num_scalar_prefetch=0,
            grid=(num_cores, tpc),
            in_specs=[
                pl.BlockSpec((block_n, 1), data_idx),   # int32 target ids (tiny stream)
                pl.BlockSpec((block_n, c), data_idx),   # logits tile
                pl.BlockSpec((block_n, c), data_idx),   # centroid-probability tile
            ],
            out_specs=pl.BlockSpec((1, 3, c), lambda ci, ji: (ci, 0, 0)),
        ),
        compiler_params=pltpu.CompilerParams(
            dimension_semantics=("parallel", "arbitrary"),
            vmem_limit_bytes=vmem_limit,
        ),
    )(target.astype(jnp.int32).reshape(n, 1), output, centroids)

    # Fold cores + lanes (tiny: num_cores * 3 * C floats) and apply the 1/N reductions:
    #   [sum -logp_tgt, sum p*(logp - log cent), sum guarded p*logp] / N
    # The third entry already equals -mean(entropy).
    return jnp.sum(partials, axis=(0, 2)) / n


def _reference(output, target, centroids):
    # Plain-JAX reference mirroring the PyTorch semantics.
    n, c = output.shape
    x = output.astype(jnp.float32)
    cent = centroids.astype(jnp.float32)
    logp = jax.nn.log_softmax(x, axis=1)
    p = jax.nn.softmax(x, axis=1)
    oh = jax.nn.one_hot(target, c, dtype=jnp.float32)
    ce = -jnp.sum(oh * logp) / n
    kl = jnp.sum(p * (logp - jnp.log(cent))) / n
    small = p < 1e-10
    ent = -jnp.sum(jnp.where(small, 0.0, p) * jnp.log(jnp.where(small, 1.0, p)), axis=1)
    return jnp.stack([ce, kl, -jnp.mean(ent)])


if __name__ == "__main__":
    key = jax.random.PRNGKey(0)
    k1, k2, k3 = jax.random.split(key, 3)

    # Small demo shapes: batch=20 (not a multiple of the tile -> exercises partial-tile
    # masking), classes=128.
    N, C = 20, 128
    output = jax.random.normal(k1, (N, C), dtype=jnp.float32) * 2.0
    target = jax.random.randint(k2, (N,), 0, C, dtype=jnp.int32)
    centroids = jax.nn.softmax(jax.random.normal(k3, (N, C), dtype=jnp.float32), axis=1)

    ref = _reference(output, target, centroids)

    # (a) Multi-tile path: block_n=8 -> 3 tiles, grid (2 "cores" x 2 steps); last real
    #     tile is partially masked and the remainder step is fully masked + clamped.
    out_tiled = jax.block_until_ready(ce_kl_enp_loss(output, target, centroids, block_n=8))
    assert jnp.allclose(out_tiled, ref, rtol=1e-4, atol=1e-4), (out_tiled, ref)

    # (b) Default (large-tile, single-step) path.
    out_single = jax.block_until_ready(ce_kl_enp_loss(output, target, centroids))
    assert jnp.allclose(out_single, ref, rtol=1e-4, atol=1e-4), (out_single, ref)

    # (c) bf16 inputs streamed as-is (halves HBM traffic); math stays f32 in-register.
    out_bf16 = jax.block_until_ready(
        ce_kl_enp_loss(output.astype(jnp.bfloat16), target, centroids.astype(jnp.bfloat16)))
    ref_bf16 = _reference(output.astype(jnp.bfloat16), target, centroids.astype(jnp.bfloat16))
    assert jnp.allclose(out_bf16, ref_bf16, rtol=1e-3, atol=1e-3), (out_bf16, ref_bf16)

    print("KERNEL_OK")
</pallas_src>

<mosaic_0001>
module attributes {stable_mosaic.version = 11 : i64} {
  func.func @_ce_kl_enp_kernel(%arg0: i32, %arg1: i32, %arg2: memref<8x1xi32, #tpu.memory_space<vmem>>, %arg3: memref<8x128xf32, #tpu.memory_space<vmem>>, %arg4: memref<8x128xf32, #tpu.memory_space<vmem>>, %arg5: memref<1x3x128xf32, #tpu.memory_space<vmem>>) attributes {dimension_semantics = [#tpu.dimension_semantics<parallel>, #tpu.dimension_semantics<arbitrary>], iteration_bounds = array<i64: 2, 2>, scalar_prefetch = 0 : i64, scratch_operands = 0 : i64, tpu.core_type = #tpu.core_type<tc>, window_params = [{transform_indices = @transform_0, window_bounds = array<i64: 8, 1>}, {transform_indices = @transform_1, window_bounds = array<i64: 8, 128>}, {transform_indices = @transform_2, window_bounds = array<i64: 8, 128>}, {transform_indices = @transform_3, window_bounds = array<i64: 1, 3, 128>}]} {
    %c0_i32 = arith.constant 0 : i32
    %0 = arith.cmpi eq, %arg1, %c0_i32 : i32
    %1 = arith.extui %0 : i1 to i32
    %c0_i32_0 = arith.constant 0 : i32
    %2 = arith.cmpi ne, %1, %c0_i32_0 : i32
    scf.if %2 {
      %cst_23 = arith.constant 0.000000e+00 : f32
      %64 = vector.broadcast %cst_23 : f32 to vector<1x3x128xf32>
      %c0_24 = arith.constant 0 : index
      %c0_25 = arith.constant 0 : index
      %c0_26 = arith.constant 0 : index
      %65 = vector.load %arg5[%c0_24, %c0_25, %c0_26] : memref<1x3x128xf32, #tpu.memory_space<vmem>>, vector<1x3x128xf32>
      tpu.vector_store %arg5[%c0_24, %c0_25, %c0_26], %64 {strides = array<i32>} : memref<1x3x128xf32, #tpu.memory_space<vmem>>, vector<1x3x128xf32>,
    } else {
    }
    %c0 = arith.constant 0 : index
    %c0_1 = arith.constant 0 : index
    %3 = vector.load %arg3[%c0, %c0_1] : memref<8x128xf32, #tpu.memory_space<vmem>>, vector<8x128xf32>
    %c0_2 = arith.constant 0 : index
    %c0_3 = arith.constant 0 : index
    %4 = vector.load %arg4[%c0_2, %c0_3] : memref<8x128xf32, #tpu.memory_space<vmem>>, vector<8x128xf32>
    %c0_4 = arith.constant 0 : index
    %c0_5 = arith.constant 0 : index
    %5 = vector.load %arg2[%c0_4, %c0_5] : memref<8x1xi32, #tpu.memory_space<vmem>>, vector<8x1xi32>
    %c2_i32 = arith.constant 2 : i32
    %6 = arith.muli %arg0, %c2_i32 : i32
    %7 = arith.addi %6, %arg1 : i32
    %c8_i32 = arith.constant 8 : i32
    %8 = arith.muli %7, %c8_i32 : i32
    %9 = tpu.iota {dimensions = array<i32: 0>} : vector<8x1xi32>
    %10 = vector.broadcast %8 : i32 to vector<8x1xi32>
    %11 = arith.addi %10, %9 : vector<8x1xi32>
    %c20_i32 = arith.constant 20 : i32
    %12 = vector.broadcast %c20_i32 : i32 to vector<8x1xi32>
    %13 = arith.cmpi slt, %11, %12 : vector<8x1xi32>
    %cst = arith.constant dense<0xFF800000> : vector<8xf32>
    %14 = vector.multi_reduction <maximumf>, %3, %cst [1] : vector<8x128xf32> to vector<8xf32>
    %15 = vector.shape_cast %14 : vector<8xf32> to vector<8x1xf32>
    %16 = vector.broadcast %15 : vector<8x1xf32> to vector<8x128xf32>
    %17 = arith.subf %3, %16 : vector<8x128xf32>
    %18 = math.exp %17 : vector<8x128xf32>
    %cst_6 = arith.constant dense<0.000000e+00> : vector<8xf32>
    %19 = vector.multi_reduction <add>, %18, %cst_6 [1] : vector<8x128xf32> to vector<8xf32>
    %20 = vector.shape_cast %19 : vector<8xf32> to vector<8x1xf32>
    %21 = math.log %20 : vector<8x1xf32>
    %22 = vector.broadcast %21 : vector<8x1xf32> to vector<8x128xf32>
    %23 = arith.subf %17, %22 : vector<8x128xf32>
    %24 = vector.broadcast %20 : vector<8x1xf32> to vector<8x128xf32>
    %25 = arith.divf %18, %24 : vector<8x128xf32>
    %26 = arith.mulf %25, %23 : vector<8x128xf32>
    %27 = tpu.iota {dimensions = array<i32: 1>} : vector<8x128xi32>
    %28 = vector.broadcast %5 : vector<8x1xi32> to vector<8x128xi32>
    %29 = arith.cmpi eq, %27, %28 : vector<8x128xi32>
    %cst_7 = arith.constant 0.000000e+00 : f32
    %30 = vector.broadcast %cst_7 : f32 to vector<8x128xf32>
    %31 = arith.subf %30, %23 : vector<8x128xf32>
    %cst_8 = arith.constant 0.000000e+00 : f32
    %32 = vector.broadcast %cst_8 : f32 to vector<8x128xf32>
    %33 = arith.select %29, %31, %32 : vector<8x128xi1>, vector<8x128xf32>
    %34 = math.log %4 : vector<8x128xf32>
    %35 = arith.mulf %25, %34 : vector<8x128xf32>
    %36 = arith.subf %26, %35 : vector<8x128xf32>
    %cst_9 = arith.constant 1.000000e-10 : f32
    %37 = vector.broadcast %cst_9 : f32 to vector<8x128xf32>
    %38 = arith.cmpf olt, %25, %37 : vector<8x128xf32>
    %cst_10 = arith.constant 0.000000e+00 : f32
    %39 = vector.broadcast %cst_10 : f32 to vector<8x128xf32>
    %40 = arith.select %38, %39, %26 : vector<8x128xi1>, vector<8x128xf32>
    %cst_11 = arith.constant 0.000000e+00 : f32
    %41 = vector.shape_cast %13 : vector<8x1xi1> to vector<8x1xi1>
    %42 = vector.broadcast %41 : vector<8x1xi1> to vector<8x128xi1>
    %43 = vector.broadcast %cst_11 : f32 to vector<8x128xf32>
    %44 = arith.select %42, %33, %43 : vector<8x128xi1>, vector<8x128xf32>
    %cst_12 = arith.constant dense<0.000000e+00> : vector<128xf32>
    %45 = vector.multi_reduction <add>, %44, %cst_12 [0] : vector<8x128xf32> to vector<128xf32>
    %46 = vector.shape_cast %45 : vector<128xf32> to vector<1x128xf32>
    %cst_13 = arith.constant 0.000000e+00 : f32
    %47 = vector.shape_cast %13 : vector<8x1xi1> to vector<8x1xi1>
    %48 = vector.broadcast %47 : vector<8x1xi1> to vector<8x128xi1>
    %49 = vector.broadcast %cst_13 : f32 to vector<8x128xf32>
    %50 = arith.select %48, %36, %49 : vector<8x128xi1>, vector<8x128xf32>
    %cst_14 = arith.constant dense<0.000000e+00> : vector<128xf32>
    %51 = vector.multi_reduction <add>, %50, %cst_14 [0] : vector<8x128xf32> to vector<128xf32>
    %52 = vector.shape_cast %51 : vector<128xf32> to vector<1x128xf32>
    %cst_15 = arith.constant 0.000000e+00 : f32
    %53 = vector.shape_cast %13 : vector<8x1xi1> to vector<8x1xi1>
    %54 = vector.broadcast %53 : vector<8x1xi1> to vector<8x128xi1>
    %55 = vector.broadcast %cst_15 : f32 to vector<8x128xf32>
    %56 = arith.select %54, %40, %55 : vector<8x128xi1>, vector<8x128xf32>
    %cst_16 = arith.constant dense<0.000000e+00> : vector<128xf32>
    %57 = vector.multi_reduction <add>, %56, %cst_16 [0] : vector<8x128xf32> to vector<128xf32>
    %58 = vector.shape_cast %57 : vector<128xf32> to vector<1x128xf32>
    %c0_17 = arith.constant 0 : index
    %c0_18 = arith.constant 0 : index
    %c0_19 = arith.constant 0 : index
    %59 = vector.load %arg5[%c0_17, %c0_18, %c0_19] : memref<1x3x128xf32, #tpu.memory_space<vmem>>, vector<1x3x128xf32>
    %60 = tpu.concatenate %46, %52, %58 in 0 : vector<1x128xf32>, vector<1x128xf32>, vector<1x128xf32> -> vector<3x128xf32>
    %61 = vector.shape_cast %60 : vector<3x128xf32> to vector<1x3x128xf32>
    %62 = arith.addf %59, %61 : vector<1x3x128xf32>
    %c0_20 = arith.constant 0 : index
    %c0_21 = arith.constant 0 : index
    %c0_22 = arith.constant 0 : index
    %63 = vector.load %arg5[%c0_20, %c0_21, %c0_22] : memref<1x3x128xf32, #tpu.memory_space<vmem>>, vector<1x3x128xf32>
    tpu.vector_store %arg5[%c0_20, %c0_21, %c0_22], %62 {strides = array<i32>} : memref<1x3x128xf32, #tpu.memory_space<vmem>>, vector<1x3x128xf32>,
    return
  }
  func.func @transform_0(%arg0: i32, %arg1: i32) -> (i32, i32) {
    %c2_i32 = arith.constant 2 : i32
    %0 = arith.muli %arg0, %c2_i32 : i32
    %1 = arith.addi %0, %arg1 : i32
    %c2_i32_0 = arith.constant 2 : i32
    %2 = arith.minsi %1, %c2_i32_0 : i32
    %c0_i32 = arith.constant 0 : i32
    %c0_i32_1 = arith.constant 0 : i32
    return %2, %c0_i32 : i32, i32
  }
  func.func @transform_1(%arg0: i32, %arg1: i32) -> (i32, i32) {
    %c2_i32 = arith.constant 2 : i32
    %0 = arith.muli %arg0, %c2_i32 : i32
    %1 = arith.addi %0, %arg1 : i32
    %c2_i32_0 = arith.constant 2 : i32
    %2 = arith.minsi %1, %c2_i32_0 : i32
    %c0_i32 = arith.constant 0 : i32
    %c0_i32_1 = arith.constant 0 : i32
    return %2, %c0_i32 : i32, i32
  }
  func.func @transform_2(%arg0: i32, %arg1: i32) -> (i32, i32) {
    %c2_i32 = arith.constant 2 : i32
    %0 = arith.muli %arg0, %c2_i32 : i32
    %1 = arith.addi %0, %arg1 : i32
    %c2_i32_0 = arith.constant 2 : i32
    %2 = arith.minsi %1, %c2_i32_0 : i32
    %c0_i32 = arith.constant 0 : i32
    %c0_i32_1 = arith.constant 0 : i32
    return %2, %c0_i32 : i32, i32
  }
  func.func @transform_3(%arg0: i32, %arg1: i32) -> (i32, i32, i32) {
    %c0_i32 = arith.constant 0 : i32
    %c0_i32_0 = arith.constant 0 : i32
    %c0_i32_1 = arith.constant 0 : i32
    return %arg0, %c0_i32, %c0_i32_0 : i32, i32, i32
  }
}

</mosaic_0001>

<bundles_post_ra>
// kernel: tpu_custom_call.1
= control target key start
LH: loop header
LB: loop body
LE: loop exit
PB: predicated region body
PF: predicated region fallthrough
CT: control target
= control target key end

     0   :  { %8 = vsyncpa [#allocation3], 0  ;;  %s882_s0 = inlined_call_operand.vmem [shape: s32[20,1], index: 0, kind: input, shape index: {}]   ;;  %s883_s1 = inlined_call_operand.vmem [shape: f32[20,128], index: 1, kind: input, shape index: {}]   ;;  %s884_s2 = inlined_call_operand.hbm [shape: f32[20,128], index: 2, kind: input, shape index: {}]   ;;  %s885_s3 = inlined_call_operand.vmem [shape: f32[2,3,128], index: 3, kind: output, shape index: {}]  }
   0x1   :  { %10 = vsyncpa [#allocation3 + $0x1], 0  ;;  %s712_s12 = smov 0   ;;  %s714_s13 = smov 0  }
   0x2   :  { %s716_s14 = smov 0   ;;  %s718_s15 = smov 0  }
   0x3   :  { %s720_s16 = smov 0   ;;  %s722_s17 = smov 0  }
   0x4   :  { %s724_s18 = smov 0   ;;  %s726_s19 = smov 0  }
   0x5 LB: > { %s477_s20 = sadd.s32 4294967295, %s687_s19   ;;  %s25_s21 = sadd.s32 1, %s679_s17  ;;  %s687_s19 = sphi %s726_s19, %s16_s19   ;;  %s683_s18 = sphi %s724_s18, %s897_s18   ;;  %s679_s17 = sphi %s722_s17, %s896_s17   ;;  %s675_s16 = sphi %s720_s16, %s895_s16   ;;  %s671_s15 = sphi %s718_s15, %s894_s15   ;;  %s667_s14 = sphi %s716_s14, %s893_s14   ;;  %s663_s13 = sphi %s714_s13, %s892_s13   ;;  %s659_s12 = sphi %s712_s12, %s891_s12  }
   0x6   : > { %p26_p0 = scmp.ge.s32.totalorder %s25_s21, 2  ;;  %s28_s22 = sadd.s32 1, %s683_s18 }
   0x7   : > { %s483_s23 = sshll.u32 %s683_s18, 1  ;;  %s111_s24 = sadd.s32 1, %s667_s14 }
   0x8   : > { %s899_s21 = smov (%p26_p0, %s25_s21), 0  ;;  %s901_s22 = smov (!%p26_p0, %s28_s22), %s683_s18 }
   0x9   : > { %s101_s25 = sadd.s32 %s679_s17, %s483_s23  ;;  %p118_p1 = scmp.ne.s32.totalorder %s667_s14, %s663_s13 }
   0xa   : > { %p30_p2 = scmp.ge.s32.totalorder %s901_s22, 2  ;;  %p102_p3 = scmp.lt.s32.totalorder %s101_s25, 2 }
   0xb   : > { %p119_p4 = scmp.eq.s32.totalorder %s687_s19, 0  ;;  %p124_p5 = scmp.ne.s32.totalorder %s663_s13, %s659_s12 }
   0xc   : > { %s903_s22 = smov (%p30_p2, %s901_s22), 0  ;;  %s905_s25 = smov (!%p102_p3, %s101_s25), 2 }
   0xd   : > { %s484_s26 = sshll.u32 %s903_s22, 1  ;;  %p766_p6 = por %p119_p4, %p118_p1 }
   0xe   : > { %s105_s28 = sadd.s32 %s484_s26, %s899_s21  ;;  %p125_p7 = scmp.eq.s32.totalorder %s477_s20, 0 }
   0xf   : > { %p106_p8 = scmp.lt.s32.totalorder %s105_s28, 2  ;;  %p514_p10 = scmp.lt.s32.totalorder %s687_s19, 4 }
  0x10   : > { %p771_p9 = por %p125_p7, %p124_p5  ;;  %s204_s30 = sand.u32 1, %s667_s14  }
  0x11   : > { %s907_s28 = smov (!%p106_p8, %s105_s28), 2  ;;  %s489_s4 = sshll.u32 %s905_s25, 7 }
  0x12   : > { %s108_s5 = ssub.s32 %s905_s25, %s907_s28  ;;  %s487_s6 = sshll.u32 %s204_s30, 3 }
  0x13   : > { %p109_p11 = scmp.eq.s32.totalorder %s108_s5, 0  ;;  %s780_s9 = scalar_lea.hbm %s884_s2, %s489_s4 }
  0x14   : > { %s208_s11 = scalar_lea.vmem [#allocation2], %s487_s6  ;;  %p787_p12 = pnand %p514_p10, %p766_p6 }
  0x15   : > { %s783_s10 = scalar_select %p109_p11, %s667_s14, %s111_s24  }
  0x16   : > { %s219_s12 = sshll.u32 %s208_s11, 4  ;;  %s205_s23 = scalar_lea.sflag [#allocation3], %s204_s30  ;;  %s791_s12 = int_to_ptr.vmem [resolvable:$true] %s219_s12 }
  0x17   : > { %s591_s25 = scalar_lea.hbm %s780_s9, 128  ;;  %p593_p2 = pneg %p787_p12 }
  0x18   : > { %p592_p1 = scmp.ne.s32.totalorder %s780_s9, %s591_s25  ;;  %s596_s27 = scalar_lea.hbm %s884_s2, 384 }
  0x19   : > { %p597_p5 = scmp.lt.u32.totalorder %s780_s9, %s884_s2  ;;  %p598_p6 = scmp.lt.u32.totalorder %s596_s27, %s591_s25 }
  0x1a   : > { %p594_p3 = pnand %p593_p2, %p592_p1  ;;  %p600_p8 = scmp.lt.u32.totalorder %s591_s25, %s780_s9 }
  0x1b   : > { %p599_p7 = por %p598_p6, %p597_p5 }
  0x1c   : > { %p595_p4 = pneg %p594_p3 }
  0x1d   : > { %p601_p10 = por %p600_p8, %p599_p7 }
  0x1f   : > { %p602_p11 = pnand %p601_p10, %p595_p4 }
  0x21   : > { %605 = shalt.err (!%p602_p11)
}
  0x22   : > { %s606_s30 = scalar_lea.vmem %s791_s12, 128  ;;  %s689_s5 = smov [#allocation2]  }
  0x23   : > { %p607_p1 = scmp.ne.s32.totalorder %s791_s12, %s606_s30  ;;  %s611_s6 = sshll.u32 %s689_s5, 4  ;;  %s612_s6 = int_to_ptr.vmem [resolvable:$false] %s611_s6 }
  0x24   : > { %s613_s7 = scalar_lea.vmem %s612_s6, 256  ;;  %p614_p0 = scmp.lt.s32.totalorder %s791_s12, %s612_s6 }
  0x25   : > { %p609_p3 = pnand %p607_p1, %p593_p2  ;;  %p615_p5 = scmp.lt.s32.totalorder %s613_s7, %s606_s30 }
  0x27   : > { %p610_p13 = pneg %p609_p3  ;;  %p616_p6 = por %p615_p5, %p614_p0 }
  0x29   : > { %p617_p7 = pnand %p616_p6, %p610_p13 }
  0x2b   : > { %620 = shalt.err (!%p617_p7)
}
  0x2c   : > { %513 = dma.hbm_to_vmem [thread:$0]  (!%p787_p12), %s780_s9, 128, %s791_s12, %s205_s23  }
  0x2d   : > { %p889_p4 = scmp.lt.s32.totalorder %s687_s19, 5  ;;  %p890_p8 = scmp.ge.s32.totalorder %s687_s19, 1 }
  0x2f   : > { %p225_p2 = pnand %p890_p8, %p889_p4 }
  0x30   : > { %s230_s8 = sand.u32 (!%p225_p2), 1, %s663_s13  }
  0x31   : > { %228 = sbr.rel (%p225_p2) target bundleno = 404 (0x194), region = 32  ;;  %s825_s11 = sshll.u32 (!%p225_p2), %s230_s8, 3 }
  0x32   : > { %s231_s25 = scalar_lea.sflag (!%p225_p2), [#allocation3], %s230_s8  ;;  %s234_s24 = scalar_lea.vmem (!%p225_p2), [#allocation2], %s825_s11 }
  0x38   : > { %654 = dma.done.wait (%p771_p9), %s231_s25, 128  }
  0x39   : > { %656 = vsyncadd (%p771_p9), %s231_s25, 4294967168  ;;  %s492_s9 = sshll.u32 %s675_s16, 1  ;;  %p300_p12 = scmp.lt.s32.totalorder %s675_s16, 1 }
  0x3a   : > { %s835_s12 = sadd.s32 %s671_s15, %s492_s9  ;;  %p503_p9 = scmp.ne.s32.totalorder %s671_s15, 0 }
  0x3b   : > { %p274_p13 = scmp.lt.s32.totalorder %s835_s12, 2  ;;  %s909_s16 = smov (!%p300_p12, %s675_s16), 1  ;;  %v690_v0 = vmov (!%p503_p9), 0.0  }
  0x3c   : > { %s502_s23 = sshll.u32 %s909_s16, 2  ;;  %307 = sbr.rel (%p503_p9) target bundleno = 67 (0x43), region = 40 }
  0x3d   : > { %s275_s20 = scalar_select %p274_p13, %s835_s12, 2 }
  0x3e   : > { %s843_s29 = scalar_lea.vmem %s885_s3, %s502_s23 }
  0x3f   : > { %s911_s20 = smov (!%p274_p13, %s275_s20), 2  ;;  %308 = vst [vmem:[%s843_s29] sm:$0x7] (!%p503_p9), %v690_v0 }
  0x40   : > { %s496_s28 = sshll.u32 %s911_s20, 3 }
  0x41   : > { %s279_s5 = scalar_lea.vmem %s882_s0, %s496_s28  ;;  %s291_s8 = scalar_lea.vmem %s883_s1, %s496_s28 }
  0x43 PF: > { %v309_v1 = vld [vmem:[%s291_s8] sm:$0xff]  ;;  %v691_v3 = vmov 0   ;;  %v315_v10 = vlaneseq  ;;  %s505_s15 = sshll.u32 %s835_s12, 3  ;;  %vm371_vm3 = vcmask 1040384   ;;  %vm373_vm4 = vcmask 1041408  }
  0x44   : > { %320 = vmax.xlane.f32.xlu0 %v309_v1  ;;  %v311_v2 = vld [vmem:[%s279_s5] sm:$0xff]  ;;  %581 = vset.pattern.permute.xlu1 %v691_v3  ;;  %v317_v13 = vstv %s505_s15 }
  0x45   : > { %582 = vset.pattern.permute.xlu0 %v691_v3  ;;  %336 = vperm.xlu1 %581, %v311_v2   ;;  %v310_v8 = vld [vmem:[%s234_s24] sm:$0xff]  ;;  %v316_v11 = vshrl.u32 %v315_v10, 7  ;;  %v334_v15 = vand.u32 127, %v315_v10 }
  0x46   : > { %v370_v49 = vld [vmem:[%s843_s29] sm:$0x7] }
  0x47   : > { %v318_v18 = vadd.s32 %v317_v13, %v316_v11 }
  0x49   : > { %vm319_vm1 = vcmp.lt.s32.totalorder %v318_v18, 20 }
  0xc4   : > { %v337_v19 = vpop.permute.xlu1 %336 }
  0xc5   : > { %vm338_vm0 = vcmp.eq.s32.totalorder %v334_v15, %v337_v19 }
  0xd1   : > { %v321_v4 = vpop.xlane.xlu0 %320 }
  0xd2   : > { %v322_v5 = vsub.f32 %v309_v1, %v321_v4 }
  0xd4   : > { %v323_v6 = vmul.f32 1.442695, %v322_v5 }
  0xd6   : > { %583 = vpow2.f32 %v323_v6 }
  0xd7   : > { %585 = vlog2.f32 %v310_v8 }
  0xe0   : > { %v584_v7 = vpop.eup %583 }
  0xe1   : > { %325 = vadd.xlane.f32.xlu0 %v584_v7  ;;  %v586_v12 = vpop.eup %585 }
  0xe2   : > { %v342_v20 = vmul.f32 0.6931472, %v586_v12 }
 0x16e   : > { %v326_v9 = vpop.xlane.xlu0 %325 }
 0x16f   : > { %587 = vlog2.f32 %v326_v9 }
 0x170   : > { %589 = vrcp.f32 %v326_v9 }
 0x179   : > { %v588_v14 = vpop.eup %587 }
 0x17a   : > { %v590_v16 = vpop.eup %589  ;;  %v328_v17 = vmul.f32 0.6931472, %v588_v14 }
 0x17b   : > { %v331_v21 = vmul.f32 %v590_v16, %v584_v7 }
 0x17c   : > { %v329_v22 = vsub.f32 %v322_v5, %v328_v17 }
 0x17d   : > { %v343_v25 = vmul.f32 %v342_v20, %v331_v21  ;;  %vm345_vm2 = vcmp.lt.f32.partialorder %v331_v21, 1e-10 }
 0x17e   : > { %v332_v23 = vmul.f32 %v331_v21, %v329_v22  ;;  %v339_v24 = vsub.f32 0.0, %v329_v22 }
 0x180   : > { %v340_v26 = vsel %vm338_vm0, %v339_v24, 0.0  ;;  %v344_v27 = vsub.f32 %v332_v23, %v343_v25  ;;  %v346_v28 = vsel %vm345_vm2, 0.0, %v332_v23 }
 0x181   : > { %v349_v29 = vsel %vm319_vm1, %v340_v26, 0.0  ;;  %v363_v30 = vsel %vm319_vm1, %v346_v28, 0.0 }
 0x182   : > { %v350_v31 = vrot.slane %v349_v29, 4  ;;  %v356_v32 = vsel %vm319_vm1, %v344_v27, 0.0  ;;  %v364_v33 = vrot.slane %v363_v30, 4 }
 0x183   : > { %v357_v34 = vrot.slane %v356_v32, 4 }
 0x184   : > { %v351_v35 = vadd.f32 %v350_v31, %v349_v29  ;;  %v365_v36 = vadd.f32 %v364_v33, %v363_v30 }
 0x185   : > { %v358_v37 = vadd.f32 %v357_v34, %v356_v32 }
 0x186   : > { %v352_v38 = vrot.slane %v351_v35, 2  ;;  %v366_v39 = vrot.slane %v365_v36, 2 }
 0x187   : > { %v359_v40 = vrot.slane %v358_v37, 2 }
 0x188   : > { %v353_v41 = vadd.f32 %v352_v38, %v351_v35  ;;  %v367_v42 = vadd.f32 %v366_v39, %v365_v36 }
 0x189   : > { %v360_v43 = vadd.f32 %v359_v40, %v358_v37 }
 0x18a   : > { %v354_v44 = vrot.slane %v353_v41, 1  ;;  %v368_v45 = vrot.slane %v367_v42, 1 }
 0x18b   : > { %v361_v46 = vrot.slane %v360_v43, 1 }
 0x18c   : > { %v355_v47 = vadd.f32 %v354_v44, %v353_v41  ;;  %v369_v50 = vadd.f32 %v368_v45, %v367_v42 }
 0x18d   : > { %v362_v48 = vadd.f32 %v361_v46, %v360_v43 }
 0x18f   : > { %v372_v51 = vsel %vm371_vm3, %v355_v47, %v362_v48 }
 0x190   : > { %v374_v52 = vsel %vm373_vm4, %v372_v51, %v369_v50 }
 0x191   : > { %v375_v53 = vadd.f32 %v374_v52, %v370_v49 }
 0x193   : > { %376 = vst [vmem:[%s843_s29] sm:$0x7] %v375_v53 }
 0x194 PF: > { %s16_s19 = sadd.s32 1, %s687_s19   ;;  %s891_s12 = smov %s663_s13 }
 0x195   : > { %p13_p0 = scmp.ge.s32.totalorder %s16_s19, 6   ;;  %s892_s13 = smov %s667_s14 }
 0x196   : > { %s893_s14 = smov %s783_s10  ;;  %s894_s15 = smov %s679_s17 }
 0x197   : > { %s895_s16 = smov %s683_s18  ;;  %s896_s17 = smov %s899_s21 }
 0x198   : > { %s897_s18 = smov %s903_s22  ;;  %15 = sbr.rel (!%p13_p0) target bundleno = 5 (0x5), region = 82 }
 0x19f   :  { %396 = vsyncpa [#allocation3], 1 }
 0x1a0   :  { %398 = vsyncpa [#allocation3 + $0x1], 1 }

</bundles_post_ra>
